<compile_context>
chip_gen: v7x
topology: tpu7x:2x2x1
jax: 0.10.0
libtpu: 0.0.40
codegen_flags: <defaults>
</compile_context>

<pallas_src>
import jax
import jax.numpy as jnp
from jax.experimental import pallas as pl
from jax.experimental.pallas import tpu as pltpu


def _round_up(x, m):
    return ((x + m - 1) // m) * m


def _vmem_budget_bytes():
    """~75% of per-core VMEM (leaves headroom for compiler scratch / sems)."""
    try:
        cap = pltpu.get_tpu_info().vmem_capacity_bytes
    except Exception:
        cap = 64 * 1024 * 1024  # conservative default (v7x per-TC VMEM)
    return (3 * cap) // 4


# ---------------------------------------------------------------------------
# Kernel bodies
# ---------------------------------------------------------------------------
def _ffn_resident_kernel(x_ref, w1_ref, b1_ref, w2_ref, b2_ref, o_ref):
    """Both weight matrices fully VMEM-resident; one fused body per row tile."""
    # x_ref: (TM, C)  w1_ref: (C, H)  b1_ref: (1, H)  w2_ref: (H, C)  b2_ref: (1, C)
    h = jnp.dot(x_ref[...], w1_ref[...], preferred_element_type=jnp.float32)
    h = jnp.maximum(h + b1_ref[...], 0.0)
    y = jnp.dot(h.astype(w2_ref.dtype), w2_ref[...],
                preferred_element_type=jnp.float32)
    o_ref[...] = (y + b2_ref[...]).astype(o_ref.dtype)


def _ffn_tiled_kernel(x_ref, w1_ref, b1_ref, w2_ref, b2_ref, o_ref, acc_ref):
    """Hidden dim tiled on the last ('arbitrary') grid axis; f32 accumulator."""
    # x_ref: (TM, C)  w1_ref: (C, TH)  b1_ref: (1, TH)  w2_ref: (TH, C)
    # b2_ref: (1, C)  o_ref: (TM, C)   acc_ref: (TM, C) f32, resident across k.
    k = pl.program_id(1)

    @pl.when(k == 0)
    def _():
        acc_ref[...] = jnp.zeros_like(acc_ref)

    h = jnp.dot(x_ref[...], w1_ref[...], preferred_element_type=jnp.float32)
    h = jnp.maximum(h + b1_ref[...], 0.0)
    acc_ref[...] += jnp.dot(h.astype(w2_ref.dtype), w2_ref[...],
                            preferred_element_type=jnp.float32)

    @pl.when(k == pl.num_programs(1) - 1)
    def _():
        o_ref[...] = (acc_ref[...] + b2_ref[...]).astype(o_ref.dtype)


# ---------------------------------------------------------------------------
# Wrapper
# ---------------------------------------------------------------------------
def feed_forward(x, w1, b1, w2, b2, *, block_rows=512, block_hidden=2048,
                 compute_dtype=None, weights_resident=None):
    """FeedForward: ReLU(x @ w1 + b1) @ w2 + b2   (dropout = eval identity).

    x : (B, T, C); w1: (C, H); b1: (H,); w2: (H, C); b2: (C,).
    compute_dtype: MXU operand dtype (accumulation is always f32). Defaults to
      bfloat16 when x is float32.
    weights_resident: None = auto (resident iff W1+W2 fit the VMEM budget);
      True/False to force the mode.
    Returns (B, T, C) in x.dtype.
    """
    B, T, C = x.shape
    Cin, H = w1.shape
    assert Cin == C and w2.shape == (H, C) and b1.shape == (H,) and b2.shape == (C,)
    M = B * T
    out_dtype = x.dtype
    out_size = jnp.dtype(out_dtype).itemsize

    if compute_dtype is None:
        compute_dtype = jnp.bfloat16 if x.dtype == jnp.float32 else x.dtype
    compute_dtype = jnp.dtype(compute_dtype)
    cs = compute_dtype.itemsize

    vmem_budget = _vmem_budget_bytes()

    # ---- Row tile: multiple of sublane packing (16 for bf16, 8 for f32),
    #      MXU-friendly default (512 is 256-aligned), and small enough that
    #      >= 2 row tiles exist whenever M allows (megacore sharding).
    row_mult = 16 if cs == 2 else 8
    if M >= 2 * row_mult:
        tm_cap = _round_up(pl.cdiv(M, 2), row_mult)
    else:
        tm_cap = _round_up(max(M, 1), row_mult)
    tm = min(_round_up(block_rows, row_mult), tm_cap)

    # ---- VMEM footprint models (double-buffered tiles, f32 intermediates).
    def resident_bytes(tm_):
        return (2 * tm_ * C * cs + 2 * tm_ * C * out_size   # x / y tiles
                + 2 * C * H * cs + 2 * H * C * cs           # W1, W2 (resident)
                + 2 * (H + C) * 4                           # biases
                + tm_ * H * 4)                              # f32 hidden activations

    def tiled_bytes(tm_, th_, nbuf):
        return (2 * tm_ * C * cs + 2 * tm_ * C * out_size   # x / y tiles
                + nbuf * C * th_ * cs + nbuf * th_ * C * cs  # W1/W2 tiles
                + 2 * (th_ + C) * 4                          # bias tiles
                + tm_ * C * 4                                # f32 accumulator
                + tm_ * th_ * 4)                             # f32 hidden tile

    if weights_resident is None:
        weights_resident = resident_bytes(tm) <= vmem_budget

    if weights_resident:
        th = H
        n_k = 1
        grid = (pl.cdiv(M, tm),)
    else:
        # Hidden tile: largest 128-aligned divisor of H (capped by block_hidden)
        # whose tiled footprint fits the VMEM budget.
        cands = [c for c in (2048, 1024, 512, 256, 128)
                 if c <= min(H, block_hidden) and H % c == 0 and c % 128 == 0]
        if not cands:
            cands = [H]  # block == full dim is always legal
        while tm > row_mult and tiled_bytes(tm, cands[-1], 3) > vmem_budget:
            tm = _round_up(tm // 2, row_mult)
        th = cands[-1]
        for c in cands:
            if tiled_bytes(tm, c, 3) <= vmem_budget:
                th = c
                break
        n_k = H // th
        grid = (pl.cdiv(M, tm), n_k)

    # ---- Prepare operands (dtype cast only; no host-side row padding).
    x2 = x.reshape(M, C).astype(compute_dtype)
    w1c = w1.astype(compute_dtype)
    w2c = w2.astype(compute_dtype)
    b1_2d = b1.reshape(1, H).astype(jnp.float32)
    b2_2d = b2.reshape(1, C).astype(jnp.float32)

    # ---- Advisory cost estimate (2 matmuls => 4*M*C*H flops); weight bytes
    #      depend on how many times the weights are streamed from HBM.
    n_row_tiles = grid[0]
    w_passes = 1 if weights_resident else n_row_tiles
    flops = 4 * M * C * H
    bytes_accessed = (M * C * cs + M * C * out_size
                      + w_passes * (C * H * cs + H * C * cs)
                      + (H + C) * 4)
    cost = pl.CostEstimate(flops=flops, transcendentals=0,
                           bytes_accessed=int(bytes_accessed))

    # ---- Specs per mode.
    if weights_resident:
        kernel = _ffn_resident_kernel
        in_specs = [
            pl.BlockSpec((tm, C), lambda i: (i, 0)),        # x rows
            pl.BlockSpec((C, H), lambda i: (0, 0)),         # W1 (DMA'd once)
            pl.BlockSpec((1, H), lambda i: (0, 0)),         # b1
            pl.BlockSpec((H, C), lambda i: (0, 0)),         # W2 (DMA'd once)
            pl.BlockSpec((1, C), lambda i: (0, 0)),         # b2
        ]
        out_specs = pl.BlockSpec((tm, C), lambda i: (i, 0))
        scratch_shapes = []
        dim_sem = ("parallel",)
    else:
        kernel = _ffn_tiled_kernel
        if n_k >= 3:
            # Deeper weight prefetch to hide weight DMA (most useful on v5e).
            w1_spec = pl.BlockSpec((C, th), lambda i, k: (0, k),
                                   pipeline_mode=pl.Buffered(3))
            w2_spec = pl.BlockSpec((th, C), lambda i, k: (k, 0),
                                   pipeline_mode=pl.Buffered(3))
        else:
            w1_spec = pl.BlockSpec((C, th), lambda i, k: (0, k))
            w2_spec = pl.BlockSpec((th, C), lambda i, k: (k, 0))
        in_specs = [
            pl.BlockSpec((tm, C), lambda i, k: (i, 0)),     # x rows
            w1_spec,                                        # W1 hidden tile
            pl.BlockSpec((1, th), lambda i, k: (0, k)),     # b1 hidden tile
            w2_spec,                                        # W2 hidden tile
            pl.BlockSpec((1, C), lambda i, k: (0, 0)),      # b2
        ]
        out_specs = pl.BlockSpec((tm, C), lambda i, k: (i, 0))
        scratch_shapes = [pltpu.VMEM((tm, C), jnp.float32)]
        dim_sem = ("parallel", "arbitrary")

    out2 = pl.pallas_call(
        kernel,
        out_shape=jax.ShapeDtypeStruct((M, C), out_dtype),
        grid_spec=pltpu.PrefetchScalarGridSpec(
            num_scalar_prefetch=0,
            grid=grid,
            in_specs=in_specs,
            out_specs=out_specs,
            scratch_shapes=scratch_shapes,
        ),
        compiler_params=pltpu.CompilerParams(
            dimension_semantics=dim_sem,
            vmem_limit_bytes=int(vmem_budget),
        ),
        cost_estimate=cost,
    )(x2, w1c, b1_2d, w2c, b2_2d)

    return out2.reshape(B, T, C)


def _reference(x, w1, b1, w2, b2):
    B, T, C = x.shape
    y = jnp.maximum(x.reshape(-1, C) @ w1 + b1, 0.0) @ w2 + b2
    return y.reshape(B, T, C)


if __name__ == "__main__":
    # Small config: n_embd=32 -> hidden=4*32=128, batch=2, seq=8.
    B, T, C = 2, 8, 32
    H = 4 * C

    key = jax.random.PRNGKey(0)
    kx, kw1, kb1, kw2, kb2, kx2, kx3, kw = jax.random.split(key, 8)

    x = jax.random.normal(kx, (B, T, C), dtype=jnp.float32)
    w1 = jax.random.uniform(kw1, (C, H), jnp.float32, -1.0 / C**0.5, 1.0 / C**0.5)
    b1 = jax.random.uniform(kb1, (H,), jnp.float32, -1.0 / C**0.5, 1.0 / C**0.5)
    w2 = jax.random.uniform(kw2, (H, C), jnp.float32, -1.0 / H**0.5, 1.0 / H**0.5)
    b2 = jax.random.uniform(kb2, (C,), jnp.float32, -1.0 / H**0.5, 1.0 / H**0.5)

    ref = _reference(x, w1, b1, w2, b2)

    # 1) Default path: bf16 MXU operands, resident weights (auto) — loose tol.
    y = feed_forward(x, w1, b1, w2, b2)
    jax.block_until_ready(y)
    assert y.shape == (B, T, C)
    assert jnp.allclose(y, ref, atol=2.5e-1, rtol=5e-2), "bf16 mismatch vs reference"

    # 2) f32 compute path (tight tolerance).
    y32 = feed_forward(x, w1, b1, w2, b2, compute_dtype=jnp.float32)
    jax.block_until_ready(y32)
    assert jnp.allclose(y32, ref, atol=1e-4, rtol=1e-4), "f32 mismatch vs reference"

    # 3) Ragged M (B*T not a multiple of the row tile) — handled via partial
    #    blocks, no host-side padding.
    T2 = 10
    x_ragged = jax.random.normal(kx2, (B, T2, C), dtype=jnp.float32)
    y_ragged = feed_forward(x_ragged, w1, b1, w2, b2, compute_dtype=jnp.float32)
    jax.block_until_ready(y_ragged)
    ref_ragged = _reference(x_ragged, w1, b1, w2, b2)
    assert jnp.allclose(y_ragged, ref_ragged, atol=1e-4, rtol=1e-4), "ragged mismatch"

    # 4) Forced hidden-tiled path (accumulator + buffered weight prefetch),
    #    n_embd=128 -> hidden=512, hidden tile 128 -> 4 k-steps.
    C2 = 128
    H2 = 4 * C2
    kw1b, kb1b, kw2b, kb2b = jax.random.split(kw, 4)
    x_b = jax.random.normal(kx3, (B, T, C2), dtype=jnp.float32)
    w1_b = jax.random.uniform(kw1b, (C2, H2), jnp.float32, -1.0 / C2**0.5, 1.0 / C2**0.5)
    b1_b = jax.random.uniform(kb1b, (H2,), jnp.float32, -1.0 / C2**0.5, 1.0 / C2**0.5)
    w2_b = jax.random.uniform(kw2b, (H2, C2), jnp.float32, -1.0 / H2**0.5, 1.0 / H2**0.5)
    b2_b = jax.random.uniform(kb2b, (C2,), jnp.float32, -1.0 / H2**0.5, 1.0 / H2**0.5)
    y_t = feed_forward(x_b, w1_b, b1_b, w2_b, b2_b, block_hidden=128,
                       compute_dtype=jnp.float32, weights_resident=False)
    jax.block_until_ready(y_t)
    ref_t = _reference(x_b, w1_b, b1_b, w2_b, b2_b)
    assert jnp.allclose(y_t, ref_t, atol=1e-4, rtol=1e-4), "tiled-path mismatch"

    print("KERNEL_OK")
</pallas_src>

<mosaic_0001>
module attributes {stable_mosaic.version = 11 : i64} {
  func.func @_ffn_resident_kernel(%arg0: i32, %arg1: memref<16x32xbf16, #tpu.memory_space<vmem>>, %arg2: memref<32x128xbf16, #tpu.memory_space<vmem>>, %arg3: memref<1x128xf32, #tpu.memory_space<vmem>>, %arg4: memref<128x32xbf16, #tpu.memory_space<vmem>>, %arg5: memref<1x32xf32, #tpu.memory_space<vmem>>, %arg6: memref<16x32xf32, #tpu.memory_space<vmem>>) attributes {dimension_semantics = [#tpu.dimension_semantics<parallel>], iteration_bounds = array<i64: 1>, scalar_prefetch = 0 : i64, scratch_operands = 0 : i64, tpu.core_type = #tpu.core_type<tc>, window_params = [{transform_indices = @transform_0, window_bounds = array<i64: 16, 32>}, {pipeline_mode = #tpu.pipeline_mode<synchronous>, transform_indices = @transform_1, window_bounds = array<i64: 32, 128>}, {pipeline_mode = #tpu.pipeline_mode<synchronous>, transform_indices = @transform_2, window_bounds = array<i64: 1, 128>}, {pipeline_mode = #tpu.pipeline_mode<synchronous>, transform_indices = @transform_3, window_bounds = array<i64: 128, 32>}, {pipeline_mode = #tpu.pipeline_mode<synchronous>, transform_indices = @transform_4, window_bounds = array<i64: 1, 32>}, {transform_indices = @transform_5, window_bounds = array<i64: 16, 32>}]} {
    %c0 = arith.constant 0 : index
    %c0_0 = arith.constant 0 : index
    %0 = vector.load %arg1[%c0, %c0_0] : memref<16x32xbf16, #tpu.memory_space<vmem>>, vector<16x32xbf16>
    %c0_1 = arith.constant 0 : index
    %c0_2 = arith.constant 0 : index
    %1 = vector.load %arg2[%c0_1, %c0_2] : memref<32x128xbf16, #tpu.memory_space<vmem>>, vector<32x128xbf16>
    %cst = arith.constant dense<0.000000e+00> : vector<16x128xf32>
    %2 = tpu.matmul %0, %1, %cst {dimension_numbers = #tpu.dot_dimension_numbers<[1], [0], [0], [1], [0, 0, 1, 1], [], []>} : vector<16x32xbf16>, vector<32x128xbf16>, vector<16x128xf32> -> vector<16x128xf32>
    %c0_3 = arith.constant 0 : index
    %c0_4 = arith.constant 0 : index
    %3 = vector.load %arg3[%c0_3, %c0_4] : memref<1x128xf32, #tpu.memory_space<vmem>>, vector<1x128xf32>
    %4 = vector.broadcast %3 : vector<1x128xf32> to vector<16x128xf32>
    %5 = arith.addf %2, %4 : vector<16x128xf32>
    %cst_5 = arith.constant 0.000000e+00 : f32
    %6 = vector.broadcast %cst_5 : f32 to vector<16x128xf32>
    %7 = arith.maximumf %5, %6 : vector<16x128xf32>
    %8 = arith.truncf %7 : vector<16x128xf32> to vector<16x128xbf16>
    %c0_6 = arith.constant 0 : index
    %c0_7 = arith.constant 0 : index
    %9 = vector.load %arg4[%c0_6, %c0_7] : memref<128x32xbf16, #tpu.memory_space<vmem>>, vector<128x32xbf16>
    %cst_8 = arith.constant dense<0.000000e+00> : vector<16x32xf32>
    %10 = tpu.matmul %8, %9, %cst_8 {dimension_numbers = #tpu.dot_dimension_numbers<[1], [0], [0], [1], [0, 0, 1, 1], [], []>} : vector<16x128xbf16>, vector<128x32xbf16>, vector<16x32xf32> -> vector<16x32xf32>
    %c0_9 = arith.constant 0 : index
    %c0_10 = arith.constant 0 : index
    %11 = vector.load %arg5[%c0_9, %c0_10] : memref<1x32xf32, #tpu.memory_space<vmem>>, vector<1x32xf32>
    %12 = vector.broadcast %11 : vector<1x32xf32> to vector<16x32xf32>
    %13 = arith.addf %10, %12 : vector<16x32xf32>
    %c0_11 = arith.constant 0 : index
    %c0_12 = arith.constant 0 : index
    %14 = vector.load %arg6[%c0_11, %c0_12] : memref<16x32xf32, #tpu.memory_space<vmem>>, vector<16x32xf32>
    tpu.vector_store %arg6[%c0_11, %c0_12], %13 {strides = array<i32>} : memref<16x32xf32, #tpu.memory_space<vmem>>, vector<16x32xf32>,
    return
  }
  func.func @transform_0(%arg0: i32) -> (i32, i32) {
    %c0_i32 = arith.constant 0 : i32
    %c0_i32_0 = arith.constant 0 : i32
    return %arg0, %c0_i32 : i32, i32
  }
  func.func @transform_1(%arg0: i32) -> (i32, i32) {
    %c0_i32 = arith.constant 0 : i32
    %c0_i32_0 = arith.constant 0 : i32
    %c0_i32_1 = arith.constant 0 : i32
    return %c0_i32, %c0_i32_0 : i32, i32
  }
  func.func @transform_2(%arg0: i32) -> (i32, i32) {
    %c0_i32 = arith.constant 0 : i32
    %c0_i32_0 = arith.constant 0 : i32
    %c0_i32_1 = arith.constant 0 : i32
    return %c0_i32, %c0_i32_0 : i32, i32
  }
  func.func @transform_3(%arg0: i32) -> (i32, i32) {
    %c0_i32 = arith.constant 0 : i32
    %c0_i32_0 = arith.constant 0 : i32
    %c0_i32_1 = arith.constant 0 : i32
    return %c0_i32, %c0_i32_0 : i32, i32
  }
  func.func @transform_4(%arg0: i32) -> (i32, i32) {
    %c0_i32 = arith.constant 0 : i32
    %c0_i32_0 = arith.constant 0 : i32
    %c0_i32_1 = arith.constant 0 : i32
    return %c0_i32, %c0_i32_0 : i32, i32
  }
  func.func @transform_5(%arg0: i32) -> (i32, i32) {
    %c0_i32 = arith.constant 0 : i32
    %c0_i32_0 = arith.constant 0 : i32
    return %arg0, %c0_i32 : i32, i32
  }
}

</mosaic_0001>

<bundles_post_ra>
// kernel: tpu_custom_call.1
= control target key start
LH: loop header
LB: loop body
LE: loop exit
PB: predicated region body
PF: predicated region fallthrough
CT: control target
= control target key end

     0   :  { %v324_v1 = vmov 0.0   ;;  %vm325_vm0 = vmmov 0   ;;  %vm52_vm1 = vcmask 261120   ;;  %s413_s0 = inlined_call_operand.vmem [shape: bf16[16,32], index: 0, kind: input, shape index: {}]   ;;  %s414_s1 = inlined_call_operand.vmem [shape: bf16[32,128], index: 1, kind: input, shape index: {}]   ;;  %s415_s2 = inlined_call_operand.vmem [shape: f32[1,128], index: 2, kind: input, shape index: {}]   ;;  %s416_s3 = inlined_call_operand.vmem [shape: bf16[128,32], index: 3, kind: input, shape index: {}]   ;;  %s417_s4 = inlined_call_operand.vmem [shape: f32[1,32], index: 4, kind: input, shape index: {}]   ;;  %s418_s5 = inlined_call_operand.hbm [shape: f32[16,32], index: 5, kind: output, shape index: {}]  }
   0x1   :  { %v289_v0 = vld [vmem:[%s414_s1] sm:$0xff]   ;;  %256 = vmatprep.subr.bf16.mxu0 %v324_v1  ;;  %264 = vmatprep.subr.bf16.mxu1 %v324_v1  ;;  %v290_v2 = vld [vmem:[%s414_s1 + $0x8] sm:$0xff]   ;;  %v294_v6 = vld [vmem:[%s416_s3 + $0x10] sm:$0xff]  }
   0x2   :  { %257 = vmatpush3.bf16.msra.mxu0 %v289_v0  ;;  %260 = vmatprep.mubr.msk.bf16.mxu0 %vm325_vm0, %v324_v1  ;;  %v292_v3 = vld [vmem:[%s416_s3] sm:$0xff]   ;;  %v293_v5 = vld [vmem:[%s416_s3 + $0x8] sm:$0xff]  }
   0x3   :  { %258 = vmatprep.subr.bf16.mxu0 %v324_v1  ;;  %280 = vmatprep.mubr.msk.bf16.mxu1 %vm325_vm0, %v324_v1  ;;  %v291_v4 = vld [vmem:[%s413_s0] sm:$0xff]  }
   0x4   :  { %265 = vmatpush3.bf16.msra.mxu1 %v292_v3 }
   0x5   :  { %266 = vmatprep.subr.bf16.mxu1 %v324_v1 }
   0x6   :  { %259 = vmatpush3.bf16.msra.mxu0 %v290_v2 }
   0x8   :  { %267 = vmatpush3.bf16.msra.mxu1 %v293_v5 }
   0x9   :  { %261 = vmatmul.mubr.msk.bf16.vlgmr.msra.gmra.mrb[0].mxu0 %vm52_vm1, %v291_v4  ;;  %268 = vmatprep.subr.bf16.mxu1 %v324_v1 }
   0xa   :  { %10 = vsyncpa [#allocation3], 0  ;;  %v295_v7 = vld [vmem:[%s416_s3 + $0x18] sm:$0xff]   ;;  %v296_v8 = vld [vmem:[%s416_s3 + $0x20] sm:$0xff]  }
   0xb   :  { %v297_v9 = vld [vmem:[%s416_s3 + $0x28] sm:$0xff]   ;;  %v298_v10 = vld [vmem:[%s416_s3 + $0x30] sm:$0xff]   ;;  %v299_v11 = vld [vmem:[%s416_s3 + $0x38] sm:$0xff]   ;;  %s326_s3 = smov [#allocation2]  }
   0xc   :  { %269 = vmatpush3.bf16.msra.mxu1 %v294_v6  ;;  %v230_v12 = vld [vmem:[%s415_s2] ss:$0 sm:$0xff]  ;;  %s219_s17 = sshll.u32 %s326_s3, 4  ;;  %s220_s17 = int_to_ptr.vmem [resolvable:$true] %s219_s17 }
   0xd   :  { %270 = vmatprep.subr.bf16.mxu1 %v324_v1  ;;  %v235_v22 = vld [vmem:[%s417_s4] ss:$0 sm:$0xff]  ;;  %s300_s2 = scalar_lea.vmem %s220_s17, 256  ;;  %p305_p1 = scmp.lt.s32.totalorder %s220_s17, %s220_s17 }
   0xe   :  { %p301_p0 = scmp.ne.s32.totalorder %s220_s17, %s300_s2  ;;  %p306_p2 = scmp.lt.s32.totalorder %s300_s2, %s300_s2 }
  0x10   :  { %271 = vmatpush3.bf16.msra.mxu1 %v295_v7  ;;  %p307_p3 = por %p306_p2, %p305_p1 }
  0x11   :  { %272 = vmatprep.subr.bf16.mxu1 %v324_v1 }
  0x12   :  { %p308_p4 = pnand %p307_p3, %p301_p0 }
  0x14   :  { %273 = vmatpush3.bf16.msra.mxu1 %v296_v8 }
  0x15   :  { %274 = vmatprep.subr.bf16.mxu1 %v324_v1 }
  0x18   :  { %275 = vmatpush3.bf16.msra.mxu1 %v297_v9 }
  0x19   :  { %276 = vmatprep.subr.bf16.mxu1 %v324_v1 }
  0x1c   :  { %277 = vmatpush3.bf16.msra.mxu1 %v298_v10 }
  0x1d   :  { %278 = vmatprep.subr.bf16.mxu1 %v324_v1 }
  0x20   :  { %279 = vmatpush3.bf16.msra.mxu1 %v299_v11 }
  0xdc   :  { %v90_v13 = vpop.f32.mrb[0].mxu0 }
  0xdd   :  { %v91_v14 = vadd.f32 %v230_v12, %v90_v13  ;;  %v262_v15 = vpop.f32.mrb[1].mxu0 }
  0xde   :  { %v93_v16 = vpop.f32.mrb[2].mxu0 }
  0xdf   :  { %v94_v17 = vadd.f32 %v230_v12, %v93_v16  ;;  %v263_v18 = vpop.f32.mrb[3].mxu0  ;;  %v97_v19 = vmax.f32 %v91_v14, 0.0 }
  0xe1   :  { %v98_v20 = vmax.f32 %v94_v17, 0.0 }
  0xe3   :  { %v99_v21 = vpack.c.bf16 %v98_v20, %v97_v19 }
  0xe5   :  { %281 = vmatmul.mubr.bf16.vlgmr.msra.gmra.mrb[0].mxu1 %v99_v21 }
 0x1b8   :  { %v205_v23 = vpop.f32.mrb[0].mxu1 }
 0x1b9   :  { %v206_v24 = vadd.f32 %v235_v22, %v205_v23  ;;  %v282_v25 = vpop.f32.mrb[1].mxu1 }
 0x1ba   :  { %v208_v26 = vpop.f32.mrb[2].mxu1 }
 0x1bb   :  { %212 = vst.msk [vmem:[#allocation2] sm:$0xff] %vm52_vm1, %v206_v24  ;;  %v209_v27 = vadd.f32 %v235_v22, %v208_v26  ;;  %v283_v28 = vpop.f32.mrb[3].mxu1 }
 0x1bd   :  { %213 = vst.msk [vmem:[#allocation2 + $0x8] sm:$0xff] %vm52_vm1, %v209_v27 }
 0x1be   :  { %311 = shalt.err (!%p308_p4)
}
 0x1bf   :  { %s312_s19 = scalar_lea.hbm %s418_s5, 256 }
 0x1c0   :  { %p313_p5 = scmp.ne.s32.totalorder %s418_s5, %s312_s19  ;;  %p316_p6 = scmp.lt.u32.totalorder %s312_s19, %s418_s5 }
 0x1c2   :  { %p318_p7 = pnand %p316_p6, %p313_p5 }
 0x1c4   :  { %321 = shalt.err (!%p318_p7)
}
 0x1c5   :  { %s327_s24 = smov 128   ;;  %s328_s25 = smov 8  }
 0x1c6   :  { %225 = dma.vmem_to_hbm [thread:$0]  %s220_s17, 256, %s418_s5, [#allocation3], %s327_s24, %s327_s24, %s328_s25  }
 0x1c7   :  { %322 = dma.done.wait [#allocation3], 256  }
 0x1c8   :  { %323 = vsyncadd [#allocation3], 4294967040 }
 0x1c9   :  { %229 = vsyncpa [#allocation3], 1 }

</bundles_post_ra>
